<compile_context>
chip_gen: v6e
topology: v6e:2x2x1
jax: 0.10.0
libtpu: 0.0.40
codegen_flags: <defaults>
</compile_context>

<pallas_src>
import functools
import math

import jax
import jax.numpy as jnp
from jax.experimental import pallas as pl
from jax.experimental.pallas import tpu as pltpu


_BLOCK_BUDGET_BYTES = 1 << 20  # ~1 MiB per block; x4 (in+out, double-buffered)
                               # stays under default scoped VMEM on all gens.


def _transpose_tile_kernel(perm, x_ref, o_ref):
    # Tile-local axis permutation of the resident VMEM block.
    o_ref[...] = jnp.transpose(x_ref[...], perm)


def _prod(xs):
    out = 1
    for v in xs:
        out *= int(v)
    return out


def pallas_transpose(x, dim0, dim1):
    """Equivalent of torch.Tensor.transpose(dim0, dim1) as a Pallas TPU kernel."""
    nd = x.ndim
    if nd == 0:
        return x
    d0 = dim0 % nd
    d1 = dim1 % nd
    if d0 == d1:
        return x  # identity swap: no data movement.
    if d0 > d1:
        d0, d1 = d1, d0

    shape = x.shape
    perm = list(range(nd))
    perm[d0], perm[d1] = perm[d1], perm[d0]
    out_shape = tuple(shape[p] for p in perm)

    # Swapping a size-1 axis only relabels dimensions -> pure (free) reshape.
    if shape[d0] == 1 or shape[d1] == 1:
        return jnp.reshape(x, out_shape)

    # Canonical 5-axis decomposition: (L, A, M, B, T) -> (L, B, M, A, T).
    L = _prod(shape[:d0])
    A = int(shape[d0])
    M = _prod(shape[d0 + 1:d1])
    B = int(shape[d1])
    T = _prod(shape[d1 + 1:])

    itemsize = jnp.dtype(x.dtype).itemsize
    budget_elems = max(1, _BLOCK_BUDGET_BYTES // itemsize)
    sub_align = max(8, 32 // itemsize)  # packed-sublane multiple: 8/16/32

    if T > 1:
        # Swap does not involve the (flattened) minor axis: permutation lives
        # in the DMA index maps; in-tile permute is a lane-row reorder only.
        operand = jnp.reshape(x, (L, A, M, B, T))

        tT = T if T <= 1024 else 1024                      # full or mult of 128
        rem = max(1, budget_elems // tT)
        side = max(sub_align, (math.isqrt(rem) // sub_align) * sub_align)
        tA = A if A <= side else side                      # full or sublane mult
        tB = B if B <= side else side                      # full or sublane mult
        rem_m = max(1, budget_elems // (tA * tB * tT))
        tM = min(M, rem_m)                                 # not a minor dim
        rem_l = max(1, budget_elems // (tA * tB * tT * tM))
        tL = min(L, rem_l)                                 # batch small slabs

        grid = (pl.cdiv(L, tL), pl.cdiv(M, tM), pl.cdiv(A, tA),
                pl.cdiv(B, tB), pl.cdiv(T, tT))
        in_spec = pl.BlockSpec((tL, tA, tM, tB, tT),
                               lambda l, m, a, b, t: (l, a, m, b, t))
        out_spec = pl.BlockSpec((tL, tB, tM, tA, tT),
                                lambda l, m, a, b, t: (l, b, m, a, t))
        kernel_perm = (0, 3, 2, 1, 4)
        call_out_shape = (L, B, M, A, T)
    else:
        # Swap involves the minor axis: tile both swapped axes and do an XLU
        # transpose per tile.
        operand = jnp.reshape(x, (L, A, M, B))

        tA = A if A <= 256 else 256                        # full or mult of 128
        tB = B if B <= 256 else 256                        # full or mult of 128
        rem = max(1, budget_elems // (tA * tB))
        tM = M if M <= rem else max(sub_align, (rem // sub_align) * sub_align)
        rem_l = max(1, budget_elems // (tA * tB * tM))
        tL = min(L, rem_l)

        grid = (pl.cdiv(L, tL), pl.cdiv(M, tM), pl.cdiv(A, tA), pl.cdiv(B, tB))
        in_spec = pl.BlockSpec((tL, tA, tM, tB),
                               lambda l, m, a, b: (l, a, m, b))
        out_spec = pl.BlockSpec((tL, tB, tM, tA),
                                lambda l, m, a, b: (l, b, m, a))
        kernel_perm = (0, 3, 2, 1)
        call_out_shape = (L, B, M, A)

    out = pl.pallas_call(
        functools.partial(_transpose_tile_kernel, kernel_perm),
        out_shape=jax.ShapeDtypeStruct(call_out_shape, x.dtype),
        grid=grid,
        in_specs=[in_spec],
        out_specs=out_spec,
        compiler_params=pltpu.CompilerParams(
            dimension_semantics=("parallel",) * len(grid)),
        cost_estimate=pl.CostEstimate(
            flops=0,
            transcendentals=0,
            bytes_accessed=2 * x.size * itemsize),
    )(operand)
    return jnp.reshape(out, out_shape)


if __name__ == "__main__":
    key = jax.random.PRNGKey(0)
    # Small NCHW-style input, consistent with typical usage Transpose(1, 2).
    x = jax.random.normal(key, (2, 4, 16, 16), dtype=jnp.float32)

    # Main case: swap channel and height axes (does not touch the lane axis).
    out = jax.block_until_ready(pallas_transpose(x, 1, 2))
    ref = jnp.swapaxes(x, 1, 2)
    assert out.shape == ref.shape, (out.shape, ref.shape)
    assert out.dtype == ref.dtype, (out.dtype, ref.dtype)
    assert jnp.array_equal(out, ref), "Pallas transpose(1,2) mismatch"

    # Swap involving the last (lane) axis and the leading axis.
    out2 = jax.block_until_ready(pallas_transpose(x, 0, 3))
    assert jnp.array_equal(out2, jnp.swapaxes(x, 0, 3)), "transpose(0,3) mismatch"

    # 3-D (N, S, D) case, swap touching the minor axis with nothing in between.
    x3 = jax.random.normal(jax.random.PRNGKey(1), (2, 8, 32), dtype=jnp.float32)
    out3 = jax.block_until_ready(pallas_transpose(x3, 1, 2))
    assert jnp.array_equal(out3, jnp.swapaxes(x3, 1, 2)), "transpose(1,2) 3D mismatch"

    # Identity swap path (no kernel launch).
    assert jnp.array_equal(pallas_transpose(x, 2, 2), x)

    print("KERNEL_OK")
</pallas_src>

<mosaic_0001>
module attributes {stable_mosaic.version = 11 : i64} {
  func.func @_transpose_tile_kernel(%arg0: i32, %arg1: i32, %arg2: i32, %arg3: i32, %arg4: i32, %arg5: memref<2x4x1x16x16xf32, #tpu.memory_space<vmem>>, %arg6: memref<2x16x1x4x16xf32, #tpu.memory_space<vmem>>) attributes {dimension_semantics = [#tpu.dimension_semantics<parallel>, #tpu.dimension_semantics<parallel>, #tpu.dimension_semantics<parallel>, #tpu.dimension_semantics<parallel>, #tpu.dimension_semantics<parallel>], iteration_bounds = array<i64: 1, 1, 1, 1, 1>, scalar_prefetch = 0 : i64, scratch_operands = 0 : i64, tpu.core_type = #tpu.core_type<tc>, window_params = [{transform_indices = @transform_0, window_bounds = array<i64: 2, 4, 1, 16, 16>}, {transform_indices = @transform_1, window_bounds = array<i64: 2, 16, 1, 4, 16>}]} {
    %c0 = arith.constant 0 : index
    %c0_0 = arith.constant 0 : index
    %c0_1 = arith.constant 0 : index
    %c0_2 = arith.constant 0 : index
    %c0_3 = arith.constant 0 : index
    %0 = vector.load %arg5[%c0, %c0_0, %c0_1, %c0_2, %c0_3] : memref<2x4x1x16x16xf32, #tpu.memory_space<vmem>>, vector<2x4x1x16x16xf32>
    %1 = tpu.transpose %0, [0, 3, 2, 1, 4] : vector<2x4x1x16x16xf32> -> vector<2x16x1x4x16xf32>
    %c0_4 = arith.constant 0 : index
    %c0_5 = arith.constant 0 : index
    %c0_6 = arith.constant 0 : index
    %c0_7 = arith.constant 0 : index
    %c0_8 = arith.constant 0 : index
    %2 = vector.load %arg6[%c0_4, %c0_5, %c0_6, %c0_7, %c0_8] : memref<2x16x1x4x16xf32, #tpu.memory_space<vmem>>, vector<2x16x1x4x16xf32>
    tpu.vector_store %arg6[%c0_4, %c0_5, %c0_6, %c0_7, %c0_8], %1 {strides = array<i32>} : memref<2x16x1x4x16xf32, #tpu.memory_space<vmem>>, vector<2x16x1x4x16xf32>,
    return
  }
  func.func @transform_0(%arg0: i32, %arg1: i32, %arg2: i32, %arg3: i32, %arg4: i32) -> (i32, i32, i32, i32, i32) {
    %c0_i32 = arith.constant 0 : i32
    return %arg0, %arg2, %arg1, %arg3, %arg4 : i32, i32, i32, i32, i32
  }
  func.func @transform_1(%arg0: i32, %arg1: i32, %arg2: i32, %arg3: i32, %arg4: i32) -> (i32, i32, i32, i32, i32) {
    %c0_i32 = arith.constant 0 : i32
    return %arg0, %arg3, %arg1, %arg2, %arg4 : i32, i32, i32, i32, i32
  }
}

</mosaic_0001>

<bundles_post_ra>
// kernel: tpu_custom_call.1
= control target key start
LH: loop header
LB: loop body
LE: loop exit
PB: predicated region body
PF: predicated region fallthrough
CT: control target
= control target key end

     0   :  { %6 = vsyncpa [#allocation3], 0  ;;  %s539_s0 = inlined_call_operand.hbm [shape: f32[2,4,1,16,16], index: 0, kind: input, shape index: {}]   ;;  %s540_s1 = inlined_call_operand.hbm [shape: f32[2,16,1,4,16], index: 1, kind: output, shape index: {}]  }
   0x1   :  { %7 = vsyncpa [#allocation4], 0  ;;  %s414_s6 = smov [#allocation2]  }
   0x2   :  { %s13_s7 = sshll.u32 %s414_s6, 4  ;;  %s14_s7 = int_to_ptr.vmem [resolvable:$true] %s13_s7 }
   0x3   :  { %s378_s8 = scalar_lea.vmem %s14_s7, 2048  ;;  %p383_p1 = scmp.lt.s32.totalorder %s14_s7, %s14_s7 }
   0x4   :  { %p379_p0 = scmp.ne.s32.totalorder %s14_s7, %s378_s8  ;;  %p384_p2 = scmp.lt.s32.totalorder %s378_s8, %s378_s8 }
   0x6   :  { %p385_p3 = por %p384_p2, %p383_p1 }
   0x8   :  { %p386_p4 = pnand %p385_p3, %p379_p0 }
   0xa   :  { %389 = shalt.err (!%p386_p4)
}
   0xb   :  { %s415_s9 = smov 128   ;;  %s416_s10 = smov 8  }
   0xc   :  { %19 = dma.hbm_to_vmem [thread:$0]  %s539_s0, 2048, %s14_s7, [#allocation3], %s415_s9, %s415_s9, %s416_s10  }
   0xd   :  { %410 = dma.done.wait [#allocation3], 2048  }
   0xe   :  { %411 = vsyncadd [#allocation3], 4294965248  ;;  %v44_v0 = vlaneseq  ;;  %v417_v1 = vmov 1983009808   ;;  %v418_v3 = vmov 1934713408  }
   0xf   :  { %v42_v2 = vunpack.c.l.s4 %v417_v1  ;;  %v74_v4 = vunpack.c.l.s4 %v418_v3  ;;  %v23_v9 = vld [vmem:[#allocation2] sm:$0xff]  ;;  %v25_v10 = vld [vmem:[#allocation2 + $0x10] sm:$0xff]  ;;  %vm311_vm0 = vcmask 125952   ;;  %v24_v15 = vld [vmem:[#allocation2 + $0x8] sm:$0xff]  ;;  %v419_v55 = vmov 0.0   ;;  %s420_s0 = smov [#allocation5]  }
  0x10   :  { %v45_v5 = vshrl.u32 %v44_v0, 7  ;;  %v27_v11 = vld [vmem:[#allocation2 + $0x20] sm:$0xff]  ;;  %v29_v12 = vld [vmem:[#allocation2 + $0x30] sm:$0xff]  ;;  %v26_v16 = vld [vmem:[#allocation2 + $0x18] sm:$0xff]  ;;  %s349_s13 = sshll.u32 %s420_s0, 4  ;;  %s350_s13 = int_to_ptr.vmem [resolvable:$true] %s349_s13 }
  0x11   :  { %v43_v6 = vunpack.c.0.s8 %v42_v2  ;;  %v75_v7 = vunpack.c.0.s8 %v74_v4  ;;  %v39_v13 = vcombine.low %v23_v9, %v27_v11  ;;  %v40_v14 = vcombine.high %v23_v9, %v27_v11  ;;  %v28_v20 = vld [vmem:[#allocation2 + $0x28] sm:$0xff]  ;;  %v30_v21 = vld [vmem:[#allocation2 + $0x38] sm:$0xff]  ;;  %v440_v22 = vld [vmem:[#allocation2 + $0x40] sm:$0xff]  ;;  %s390_s14 = scalar_lea.vmem %s350_s13, 2048  ;;  %p395_p6 = scmp.lt.s32.totalorder %s350_s13, %s350_s13 }
  0x12   :  { %v55_v17 = vcombine.low %v25_v10, %v29_v12  ;;  %v56_v19 = vcombine.high %v25_v10, %v29_v12  ;;  %v107_v25 = vcombine.low %v24_v15, %v28_v20  ;;  %v123_v26 = vcombine.low %v26_v16, %v30_v21  ;;  %v444_v27 = vld [vmem:[#allocation2 + $0x50] sm:$0xff]  ;;  %v446_v28 = vld [vmem:[#allocation2 + $0x60] sm:$0xff]  ;;  %v32_v54 = vld [vmem:[#allocation2 + $0x48] sm:$0xff]  ;;  %p391_p5 = scmp.ne.s32.totalorder %s350_s13, %s390_s14  ;;  %p396_p7 = scmp.lt.s32.totalorder %s390_s14, %s390_s14 }
  0x13   :  { %v436_v8 = vsub.s32 %v43_v6, %v45_v5  ;;  %v438_v18 = vsub.s32 %v75_v7, %v45_v5  ;;  %v448_v29 = vld [vmem:[#allocation2 + $0x70] sm:$0xff]  ;;  %v108_v32 = vcombine.high %v24_v15, %v28_v20  ;;  %v124_v33 = vcombine.high %v26_v16, %v30_v21  ;;  %v34_v60 = vld [vmem:[#allocation2 + $0x58] sm:$0xff]  ;;  %v36_v61 = vld [vmem:[#allocation2 + $0x68] sm:$0xff] }
  0x14   :  { %v175_v36 = vcombine.low %v440_v22, %v446_v28  ;;  %v191_v37 = vcombine.low %v444_v27, %v448_v29  ;;  %v38_v62 = vld [vmem:[#allocation2 + $0x78] sm:$0xff]  ;;  %v176_v5 = vcombine.high %v440_v22, %v446_v28  ;;  %v192_v6 = vcombine.high %v444_v27, %v448_v29  ;;  %p397_p8 = por %p396_p7, %p395_p6 }
  0x15   :  { %v47_v23 = vrot.slane %v39_v13, %v436_v8  ;;  %v54_v24 = vrot.slane %v40_v14, %v436_v8  ;;  %v63_v30 = vrot.slane %v55_v17, %v436_v8  ;;  %v70_v31 = vrot.slane %v56_v19, %v436_v8 }
  0x16   :  { %v115_v34 = vrot.slane %v107_v25, %v436_v8  ;;  %v131_v35 = vrot.slane %v123_v26, %v436_v8  ;;  %v122_v44 = vrot.slane %v108_v32, %v436_v8  ;;  %v138_v45 = vrot.slane %v124_v33, %v436_v8  ;;  %p398_p9 = pnand %p397_p8, %p391_p5 }
  0x17   :  { %v71_v38 = vcombine.low %v47_v23, %v63_v30  ;;  %v72_v39 = vcombine.high %v47_v23, %v63_v30  ;;  %v87_v40 = vcombine.low %v54_v24, %v70_v31  ;;  %v88_v41 = vcombine.high %v54_v24, %v70_v31 }
  0x18   :  { %v139_v42 = vcombine.low %v115_v34, %v131_v35  ;;  %v140_v43 = vcombine.high %v115_v34, %v131_v35  ;;  %v155_v52 = vcombine.low %v122_v44, %v138_v45  ;;  %v156_v53 = vcombine.high %v122_v44, %v138_v45 }
  0x19   :  { %v79_v46 = vrot.slane %v71_v38, %v438_v18  ;;  %v86_v47 = vrot.slane %v72_v39, %v438_v18  ;;  %v95_v48 = vrot.slane %v87_v40, %v438_v18  ;;  %v102_v49 = vrot.slane %v88_v41, %v438_v18 }
  0x1a   :  { %v147_v50 = vrot.slane %v139_v42, %v438_v18  ;;  %v154_v51 = vrot.slane %v140_v43, %v438_v18  ;;  %v163_v1 = vrot.slane %v155_v52, %v438_v18  ;;  %v170_v2 = vrot.slane %v156_v53, %v438_v18 }
  0x1b   :  { %312 = vst.msk [vmem:[#allocation5] sm:$0xf] %vm311_vm0, %v79_v46  ;;  %v103_v56 = vcombine.high %v79_v46, %v419_v55  ;;  %314 = vst.msk [vmem:[#allocation5 + $0x8] sm:$0xf] %vm311_vm0, %v86_v47  ;;  %v104_v57 = vcombine.high %v86_v47, %v419_v55  ;;  %v105_v58 = vcombine.high %v95_v48, %v419_v55 }
  0x1c   :  { %316 = vst.msk [vmem:[#allocation5 + $0x10] sm:$0xf] %vm311_vm0, %v95_v48  ;;  %318 = vst.msk [vmem:[#allocation5 + $0x18] sm:$0xf] %vm311_vm0, %v102_v49  ;;  %v106_v59 = vcombine.high %v102_v49, %v419_v55  ;;  %v171_v63 = vcombine.high %v147_v50, %v419_v55  ;;  %v172_v0 = vcombine.high %v154_v51, %v419_v55 }
  0x1d   :  { %320 = vst.msk [vmem:[#allocation5 + $0x20] sm:$0xf] %vm311_vm0, %v147_v50  ;;  %322 = vst.msk [vmem:[#allocation5 + $0x28] sm:$0xf] %vm311_vm0, %v154_v51  ;;  %v183_v3 = vrot.slane %v175_v36, %v436_v8  ;;  %v199_v4 = vrot.slane %v191_v37, %v436_v8  ;;  %v173_v7 = vcombine.high %v163_v1, %v419_v55 }
  0x1e   :  { %313 = vst.msk [vmem:[#allocation5 + $0x4] sm:$0xf] %vm311_vm0, %v103_v56  ;;  %315 = vst.msk [vmem:[#allocation5 + $0xc] sm:$0xf] %vm311_vm0, %v104_v57  ;;  %v174_v9 = vcombine.high %v170_v2, %v419_v55  ;;  %v243_v10 = vcombine.low %v32_v54, %v36_v61  ;;  %v259_v11 = vcombine.low %v34_v60, %v38_v62 }
  0x1f   :  { %317 = vst.msk [vmem:[#allocation5 + $0x14] sm:$0xf] %vm311_vm0, %v105_v58  ;;  %319 = vst.msk [vmem:[#allocation5 + $0x1c] sm:$0xf] %vm311_vm0, %v106_v59  ;;  %v207_v12 = vcombine.low %v183_v3, %v199_v4  ;;  %v208_v13 = vcombine.high %v183_v3, %v199_v4  ;;  %v190_v14 = vrot.slane %v176_v5, %v436_v8 }
  0x20   :  { %321 = vst.msk [vmem:[#allocation5 + $0x24] sm:$0xf] %vm311_vm0, %v171_v63  ;;  %323 = vst.msk [vmem:[#allocation5 + $0x2c] sm:$0xf] %vm311_vm0, %v172_v0  ;;  %v206_v15 = vrot.slane %v192_v6, %v436_v8  ;;  %v251_v16 = vrot.slane %v243_v10, %v436_v8  ;;  %v267_v17 = vrot.slane %v259_v11, %v436_v8 }
  0x21   :  { %324 = vst.msk [vmem:[#allocation5 + $0x30] sm:$0xf] %vm311_vm0, %v163_v1  ;;  %326 = vst.msk [vmem:[#allocation5 + $0x38] sm:$0xf] %vm311_vm0, %v170_v2  ;;  %v244_v19 = vcombine.high %v32_v54, %v36_v61  ;;  %v260_v20 = vcombine.high %v34_v60, %v38_v62  ;;  %v215_v21 = vrot.slane %v207_v12, %v438_v18 }
  0x22   :  { %325 = vst.msk [vmem:[#allocation5 + $0x34] sm:$0xf] %vm311_vm0, %v173_v7  ;;  %327 = vst.msk [vmem:[#allocation5 + $0x3c] sm:$0xf] %vm311_vm0, %v174_v9  ;;  %v222_v22 = vrot.slane %v208_v13, %v438_v18  ;;  %v223_v23 = vcombine.low %v190_v14, %v206_v15  ;;  %v224_v24 = vcombine.high %v190_v14, %v206_v15 }
  0x23   :  { %v275_v25 = vcombine.low %v251_v16, %v267_v17  ;;  %v276_v26 = vcombine.high %v251_v16, %v267_v17  ;;  %v258_v27 = vrot.slane %v244_v19, %v436_v8  ;;  %v274_v28 = vrot.slane %v260_v20, %v436_v8  ;;  %328 = vst.msk [vmem:[#allocation5 + $0x40] sm:$0xf] %vm311_vm0, %v215_v21 }
  0x24   :  { %v239_v29 = vcombine.high %v215_v21, %v419_v55  ;;  %330 = vst.msk [vmem:[#allocation5 + $0x48] sm:$0xf] %vm311_vm0, %v222_v22  ;;  %v240_v30 = vcombine.high %v222_v22, %v419_v55  ;;  %v231_v31 = vrot.slane %v223_v23, %v438_v18  ;;  %v238_v32 = vrot.slane %v224_v24, %v438_v18 }
  0x25   :  { %v283_v33 = vrot.slane %v275_v25, %v438_v18  ;;  %v290_v34 = vrot.slane %v276_v26, %v438_v18  ;;  %v291_v35 = vcombine.low %v258_v27, %v274_v28  ;;  %v292_v36 = vcombine.high %v258_v27, %v274_v28 }
  0x26   :  { %329 = vst.msk [vmem:[#allocation5 + $0x44] sm:$0xf] %vm311_vm0, %v239_v29  ;;  %331 = vst.msk [vmem:[#allocation5 + $0x4c] sm:$0xf] %vm311_vm0, %v240_v30  ;;  %v241_v8 = vcombine.high %v231_v31, %v419_v55  ;;  %v242_v37 = vcombine.high %v238_v32, %v419_v55 }
  0x27   :  { %332 = vst.msk [vmem:[#allocation5 + $0x50] sm:$0xf] %vm311_vm0, %v231_v31  ;;  %334 = vst.msk [vmem:[#allocation5 + $0x58] sm:$0xf] %vm311_vm0, %v238_v32  ;;  %v307_v38 = vcombine.high %v283_v33, %v419_v55  ;;  %v308_v39 = vcombine.high %v290_v34, %v419_v55  ;;  %v299_v40 = vrot.slane %v291_v35, %v438_v18 }
  0x28   :  { %336 = vst.msk [vmem:[#allocation5 + $0x60] sm:$0xf] %vm311_vm0, %v283_v33  ;;  %338 = vst.msk [vmem:[#allocation5 + $0x68] sm:$0xf] %vm311_vm0, %v290_v34  ;;  %v306_v41 = vrot.slane %v292_v36, %v438_v18 }
  0x29   :  { %333 = vst.msk [vmem:[#allocation5 + $0x54] sm:$0xf] %vm311_vm0, %v241_v8  ;;  %335 = vst.msk [vmem:[#allocation5 + $0x5c] sm:$0xf] %vm311_vm0, %v242_v37  ;;  %v309_v42 = vcombine.high %v299_v40, %v419_v55 }
  0x2a   :  { %337 = vst.msk [vmem:[#allocation5 + $0x64] sm:$0xf] %vm311_vm0, %v307_v38  ;;  %339 = vst.msk [vmem:[#allocation5 + $0x6c] sm:$0xf] %vm311_vm0, %v308_v39  ;;  %v310_v43 = vcombine.high %v306_v41, %v419_v55 }
  0x2b   :  { %340 = vst.msk [vmem:[#allocation5 + $0x70] sm:$0xf] %vm311_vm0, %v299_v40  ;;  %342 = vst.msk [vmem:[#allocation5 + $0x78] sm:$0xf] %vm311_vm0, %v306_v41 }
  0x2c   :  { %341 = vst.msk [vmem:[#allocation5 + $0x74] sm:$0xf] %vm311_vm0, %v309_v42  ;;  %343 = vst.msk [vmem:[#allocation5 + $0x7c] sm:$0xf] %vm311_vm0, %v310_v43 }
  0x2d   :  { %401 = shalt.err (!%p398_p9)
}
  0x2e   :  { %s421_s15 = smov 64   ;;  %s422_s16 = smov 4  }
  0x2f   :  { %355 = dma.vmem_to_hbm [thread:$0]  %s350_s13, 2048, %s540_s1, [#allocation4], %s421_s15, %s421_s15, %s422_s16  }
  0x30   :  { %412 = dma.done.wait [#allocation4], 2048  }
  0x31   :  { %413 = vsyncadd [#allocation4], 4294965248 }
  0x32   :  { %359 = vsyncpa [#allocation3], 1 }
  0x33   :  { %360 = vsyncpa [#allocation4], 1 }

</bundles_post_ra>
